<compile_context>
chip_gen: v7x
topology: tpu7x:2x2x1
jax: 0.10.0
libtpu: 0.0.40
codegen_flags: <defaults>
</compile_context>

<pallas_src>
import functools
import math

import jax
import jax.numpy as jnp
from jax.experimental import pallas as pl
from jax.experimental.pallas import tpu as pltpu


def bert_attention_kernel(x_ref, mask_ref, wqkv_ref, bqkv_ref, wd_ref, bd_ref,
                          gamma_ref, beta_ref, out_ref, probs_ref, acc_ref,
                          *, num_heads, head_dim, eps, compute_dtype):
    h_idx = pl.program_id(1)

    # Zero the (S, H) dense-output accumulator at the first head of each batch.
    @pl.when(h_idx == 0)
    def _():
        acc_ref[...] = jnp.zeros_like(acc_ref)

    x = x_ref[0]                                   # (S, H)  compute_dtype
    mask = mask_ref[0]                             # (1, S)  additive f32 mask

    # Fused Q/K/V projection for this head: one (S,H) @ (H,3*hd) MXU matmul.
    qkv = jnp.dot(x, wqkv_ref[0],
                  preferred_element_type=jnp.float32) + bqkv_ref[0]   # (S, 3hd) f32
    q = qkv[:, :head_dim].astype(compute_dtype)
    k = qkv[:, head_dim:2 * head_dim].astype(compute_dtype)
    v = qkv[:, 2 * head_dim:].astype(compute_dtype)

    # Scaled dot-product attention; softmax in f32.
    scale = 1.0 / math.sqrt(head_dim)
    scores = jnp.einsum('qd,kd->qk', q, k,
                        preferred_element_type=jnp.float32) * scale   # (S, S)
    scores = scores + mask                          # broadcast (1, S) over query rows

    smax = jnp.max(scores, axis=-1, keepdims=True)
    e = jnp.exp(scores - smax)
    denom = jnp.sum(e, axis=-1, keepdims=True)
    probs = e * pl.reciprocal(denom, approx=True)   # EUP reciprocal, not a VPU divide
    # TODO(synk): attention-probs dropout and head_mask are identity (eval mode, None).
    probs_ref[0, 0] = probs.astype(probs_ref.dtype)

    # This head's context and its contribution to the output dense layer:
    #   dense(ctx) = sum_h ctx_h @ Wd[h*hd:(h+1)*hd, :]
    ctx_h = jnp.dot(probs.astype(compute_dtype), v,
                    preferred_element_type=jnp.float32)               # (S, hd)
    acc_ref[...] += jnp.dot(ctx_h.astype(compute_dtype), wd_ref[0],
                            preferred_element_type=jnp.float32)       # (S, H)

    # BertAddNorm epilogue on the last head (the out block stays resident
    # across the head axis, which is marked "arbitrary").
    @pl.when(h_idx == num_heads - 1)
    def _():
        hid = acc_ref[...] + bd_ref[...] + x_ref[0].astype(jnp.float32)
        mean = jnp.mean(hid, axis=-1, keepdims=True)
        mean_sq = jnp.mean(hid * hid, axis=-1, keepdims=True)
        var = mean_sq - mean * mean                 # one-pass (biased) variance
        normed = (hid - mean) * jax.lax.rsqrt(var + eps)
        y = normed * gamma_ref[...] + beta_ref[...]
        out_ref[0] = y.astype(out_ref.dtype)


def bert_attention(x, attention_mask, params, *, num_heads, eps=1e-12,
                   compute_dtype=jnp.float32, probs_dtype=jnp.float32):
    """x: (B, S, H), attention_mask: (B, 1, S) additive f32 mask.

    Returns (attention_output (B, S, H), attention_probs (B, nh, S, S)).
    compute_dtype controls the MXU matmul input dtype (use jnp.bfloat16 at
    production sizes); softmax / LayerNorm always run in f32.  For lane-dense
    probs writeback, S should be a multiple of 128 at production sizes (not
    required for correctness).
    """
    B, S, H = x.shape
    head_dim = H // num_heads
    (wq, bq, wk, bk, wv, bv, wd, bd, gamma, beta) = params

    # ---- wrapper-side repacking (pure layout, traced once by XLA) ----
    def w_heads(w):     # (H, H) -> (nh, H, hd)
        return w.reshape(H, num_heads, head_dim).transpose(1, 0, 2)

    def b_heads(b):     # (1, H) -> (nh, 1, hd)
        return b.reshape(num_heads, 1, head_dim)

    # Fused per-head QKV weight (nh, H, 3*hd) and bias (nh, 1, 3*hd).
    wqkv = jnp.concatenate([w_heads(wq), w_heads(wk), w_heads(wv)], axis=-1)
    bqkv = jnp.concatenate([b_heads(bq), b_heads(bk), b_heads(bv)], axis=-1)
    # Output dense weight split by head rows: (nh, hd, H).
    wd_h = wd.reshape(num_heads, head_dim, H)

    x_c = x.astype(compute_dtype)
    wqkv = wqkv.astype(compute_dtype)
    wd_h = wd_h.astype(compute_dtype)

    kernel = functools.partial(bert_attention_kernel, num_heads=num_heads,
                               head_dim=head_dim, eps=eps,
                               compute_dtype=compute_dtype)

    in_specs = [
        pl.BlockSpec((1, S, H), lambda b, h: (b, 0, 0)),                  # x
        pl.BlockSpec((1, 1, S), lambda b, h: (b, 0, 0)),                  # additive mask
        pl.BlockSpec((1, H, 3 * head_dim), lambda b, h: (h, 0, 0)),       # fused Wqkv (per head)
        pl.BlockSpec((1, 1, 3 * head_dim), lambda b, h: (h, 0, 0)),       # fused bqkv (per head)
        pl.BlockSpec((1, head_dim, H), lambda b, h: (h, 0, 0)),           # W_dense rows (per head)
        pl.BlockSpec((1, H), lambda b, h: (0, 0)),                        # b_dense
        pl.BlockSpec((1, H), lambda b, h: (0, 0)),                        # gamma
        pl.BlockSpec((1, H), lambda b, h: (0, 0)),                        # beta
    ]
    out_specs = (
        pl.BlockSpec((1, S, H), lambda b, h: (b, 0, 0)),                  # attention_output
        pl.BlockSpec((1, 1, S, S), lambda b, h: (b, h, 0, 0)),            # attention_probs
    )
    out_shape = (
        jax.ShapeDtypeStruct((B, S, H), x.dtype),
        jax.ShapeDtypeStruct((B, num_heads, S, S), probs_dtype),
    )

    return pl.pallas_call(
        kernel,
        grid=(B, num_heads),
        in_specs=in_specs,
        out_specs=out_specs,
        out_shape=out_shape,
        scratch_shapes=[pltpu.VMEM((S, H), jnp.float32)],                 # dense-output accumulator
        compiler_params=pltpu.CompilerParams(
            # batch axis is megacore-parallel; the head axis carries the
            # accumulator / resident output block -> "arbitrary".
            dimension_semantics=("parallel", "arbitrary"),
            # above the 32 MiB scoped default (v6e), inside v7x's 64 MiB.
            vmem_limit_bytes=48 * 1024 * 1024,
        ),
    )(x_c, attention_mask, wqkv, bqkv, wd_h, bd, gamma, beta)


def reference(x, mask, params, num_heads, eps=1e-12):
    (wq, bq, wk, bk, wv, bv, wd, bd, gamma, beta) = params
    B, S, H = x.shape
    hd = H // num_heads
    q = (x @ wq + bq).reshape(B, S, num_heads, hd).transpose(0, 2, 1, 3)
    k = (x @ wk + bk).reshape(B, S, num_heads, hd).transpose(0, 2, 1, 3)
    v = (x @ wv + bv).reshape(B, S, num_heads, hd).transpose(0, 2, 1, 3)
    scores = jnp.einsum('bhqd,bhkd->bhqk', q, k) / math.sqrt(hd)
    scores = scores + mask[:, :, None, :]
    probs = jax.nn.softmax(scores, axis=-1)
    ctx = jnp.einsum('bhqk,bhkd->bhqd', probs, v).transpose(0, 2, 1, 3).reshape(B, S, H)
    h = ctx @ wd + bd + x
    mean = h.mean(-1, keepdims=True)
    var = ((h - mean) ** 2).mean(-1, keepdims=True)
    y = (h - mean) / jnp.sqrt(var + eps) * gamma + beta
    return y, probs


if __name__ == "__main__":
    B, S, H, NH = 2, 8, 32, 4
    eps = 1e-12

    key = jax.random.PRNGKey(0)
    ks = jax.random.split(key, 10)
    init = lambda k, shape: 0.02 * jax.random.normal(k, shape, jnp.float32)

    x = jax.random.normal(ks[0], (B, S, H), jnp.float32)
    attention_mask = jnp.zeros((B, 1, S), jnp.float32)   # == attention_mask None

    params = (
        init(ks[1], (H, H)), init(ks[2], (1, H)),        # Wq, bq
        init(ks[3], (H, H)), init(ks[4], (1, H)),        # Wk, bk
        init(ks[5], (H, H)), init(ks[6], (1, H)),        # Wv, bv
        init(ks[7], (H, H)), init(ks[8], (1, H)),        # W_dense, b_dense
        jnp.ones((1, H), jnp.float32),                   # layer_norm gamma
        jnp.zeros((1, H), jnp.float32),                  # layer_norm beta
    )

    ref_out, ref_probs = reference(x, attention_mask, params, NH, eps)

    # f32 MXU path (tight tolerance against the f32 reference).
    out, probs = bert_attention(x, attention_mask, params, num_heads=NH, eps=eps)
    out = jax.block_until_ready(out)
    probs = jax.block_until_ready(probs)
    assert jnp.allclose(out, ref_out, atol=1e-3, rtol=1e-3)
    assert jnp.allclose(probs, ref_probs, atol=1e-3, rtol=1e-3)

    # bf16 MXU path with bf16 probs output (production config; looser tolerance).
    out16, probs16 = bert_attention(x, attention_mask, params, num_heads=NH,
                                    eps=eps, compute_dtype=jnp.bfloat16,
                                    probs_dtype=jnp.bfloat16)
    out16 = jax.block_until_ready(out16)
    probs16 = jax.block_until_ready(probs16)
    assert jnp.allclose(out16, ref_out, atol=5e-2, rtol=5e-2)
    assert jnp.allclose(probs16.astype(jnp.float32), ref_probs, atol=5e-2, rtol=5e-2)

    print("KERNEL_OK")
</pallas_src>

<mosaic_0001>
module attributes {stable_mosaic.version = 11 : i64} {
  func.func @bert_attention_kernel(%arg0: i32, %arg1: i32, %arg2: memref<1x8x32xf32, #tpu.memory_space<vmem>>, %arg3: memref<1x1x8xf32, #tpu.memory_space<vmem>>, %arg4: memref<1x32x24xf32, #tpu.memory_space<vmem>>, %arg5: memref<1x1x24xf32, #tpu.memory_space<vmem>>, %arg6: memref<1x8x32xf32, #tpu.memory_space<vmem>>, %arg7: memref<1x32xf32, #tpu.memory_space<vmem>>, %arg8: memref<1x32xf32, #tpu.memory_space<vmem>>, %arg9: memref<1x32xf32, #tpu.memory_space<vmem>>, %arg10: memref<1x8x32xf32, #tpu.memory_space<vmem>>, %arg11: memref<1x1x8x8xf32, #tpu.memory_space<vmem>>, %arg12: memref<8x32xf32, #tpu.memory_space<vmem>>) attributes {dimension_semantics = [#tpu.dimension_semantics<parallel>, #tpu.dimension_semantics<arbitrary>], iteration_bounds = array<i64: 2, 4>, scalar_prefetch = 0 : i64, scratch_operands = 1 : i64, tpu.core_type = #tpu.core_type<tc>, window_params = [{transform_indices = @transform_0, window_bounds = array<i64: 1, 8, 32>}, {transform_indices = @transform_1, window_bounds = array<i64: 1, 1, 8>}, {transform_indices = @transform_2, window_bounds = array<i64: 1, 32, 24>}, {transform_indices = @transform_3, window_bounds = array<i64: 1, 1, 24>}, {transform_indices = @transform_4, window_bounds = array<i64: 1, 8, 32>}, {pipeline_mode = #tpu.pipeline_mode<synchronous>, transform_indices = @transform_5, window_bounds = array<i64: 1, 32>}, {pipeline_mode = #tpu.pipeline_mode<synchronous>, transform_indices = @transform_6, window_bounds = array<i64: 1, 32>}, {pipeline_mode = #tpu.pipeline_mode<synchronous>, transform_indices = @transform_7, window_bounds = array<i64: 1, 32>}, {transform_indices = @transform_8, window_bounds = array<i64: 1, 8, 32>}, {transform_indices = @transform_9, window_bounds = array<i64: 1, 1, 8, 8>}]} {
    %c0_i32 = arith.constant 0 : i32
    %0 = arith.cmpi eq, %arg1, %c0_i32 : i32
    %1 = arith.extui %0 : i1 to i32
    %c0_i32_0 = arith.constant 0 : i32
    %2 = arith.cmpi ne, %1, %c0_i32_0 : i32
    scf.if %2 {
      %cst_30 = arith.constant 0.000000e+00 : f32
      %45 = vector.broadcast %cst_30 : f32 to vector<8x32xf32>
      %c0_31 = arith.constant 0 : index
      %c0_32 = arith.constant 0 : index
      %46 = vector.load %arg12[%c0_31, %c0_32] : memref<8x32xf32, #tpu.memory_space<vmem>>, vector<8x32xf32>
      tpu.vector_store %arg12[%c0_31, %c0_32], %45 {strides = array<i32>} : memref<8x32xf32, #tpu.memory_space<vmem>>, vector<8x32xf32>,
    } else {
    }
    %c0 = arith.constant 0 : index
    %c0_1 = arith.constant 0 : index
    %c0_2 = arith.constant 0 : index
    %3 = vector.load %arg2[%c0, %c0_1, %c0_2] : memref<1x8x32xf32, #tpu.memory_space<vmem>>, vector<1x8x32xf32>
    %4 = vector.shape_cast %3 : vector<1x8x32xf32> to vector<8x32xf32>
    %c0_3 = arith.constant 0 : index
    %c0_4 = arith.constant 0 : index
    %c0_5 = arith.constant 0 : index
    %5 = vector.load %arg3[%c0_3, %c0_4, %c0_5] : memref<1x1x8xf32, #tpu.memory_space<vmem>>, vector<1x1x8xf32>
    %6 = vector.shape_cast %5 : vector<1x1x8xf32> to vector<1x8xf32>
    %c0_6 = arith.constant 0 : index
    %c0_7 = arith.constant 0 : index
    %c0_8 = arith.constant 0 : index
    %7 = vector.load %arg4[%c0_6, %c0_7, %c0_8] : memref<1x32x24xf32, #tpu.memory_space<vmem>>, vector<1x32x24xf32>
    %8 = vector.shape_cast %7 : vector<1x32x24xf32> to vector<32x24xf32>
    %cst = arith.constant dense<0.000000e+00> : vector<8x24xf32>
    %9 = tpu.matmul %4, %8, %cst {dimension_numbers = #tpu.dot_dimension_numbers<[1], [0], [0], [1], [0, 0, 1, 1], [], []>} : vector<8x32xf32>, vector<32x24xf32>, vector<8x24xf32> -> vector<8x24xf32>
    %c0_9 = arith.constant 0 : index
    %c0_10 = arith.constant 0 : index
    %c0_11 = arith.constant 0 : index
    %10 = vector.load %arg5[%c0_9, %c0_10, %c0_11] : memref<1x1x24xf32, #tpu.memory_space<vmem>>, vector<1x1x24xf32>
    %11 = vector.shape_cast %10 : vector<1x1x24xf32> to vector<1x24xf32>
    %12 = vector.broadcast %11 : vector<1x24xf32> to vector<8x24xf32>
    %13 = arith.addf %9, %12 : vector<8x24xf32>
    %14 = vector.extract_strided_slice %13 {offsets = [0, 0], sizes = [8, 8], strides = [1, 1]} : vector<8x24xf32> to vector<8x8xf32>
    %15 = vector.extract_strided_slice %13 {offsets = [0, 8], sizes = [8, 8], strides = [1, 1]} : vector<8x24xf32> to vector<8x8xf32>
    %16 = vector.extract_strided_slice %13 {offsets = [0, 16], sizes = [8, 8], strides = [1, 1]} : vector<8x24xf32> to vector<8x8xf32>
    "tpu.trace_start"() <{level = 10 : i32, message = "qd,kd->qk"}> : () -> ()
    %cst_12 = arith.constant dense<0.000000e+00> : vector<8x8xf32>
    %17 = tpu.matmul %14, %15, %cst_12 {dimension_numbers = #tpu.dot_dimension_numbers<[1], [1], [0], [0], [0, 0, 1, 0], [], []>} : vector<8x8xf32>, vector<8x8xf32>, vector<8x8xf32> -> vector<8x8xf32>
    "tpu.trace_stop"() : () -> ()
    %cst_13 = arith.constant 0.353553385 : f32
    %18 = vector.broadcast %cst_13 : f32 to vector<8x8xf32>
    %19 = arith.mulf %17, %18 : vector<8x8xf32>
    %20 = vector.broadcast %6 : vector<1x8xf32> to vector<8x8xf32>
    %21 = arith.addf %19, %20 : vector<8x8xf32>
    %cst_14 = arith.constant dense<0xFF800000> : vector<8xf32>
    %22 = vector.multi_reduction <maximumf>, %21, %cst_14 [1] : vector<8x8xf32> to vector<8xf32>
    %23 = vector.shape_cast %22 : vector<8xf32> to vector<8x1xf32>
    %24 = vector.broadcast %23 : vector<8x1xf32> to vector<8x8xf32>
    %25 = arith.subf %21, %24 : vector<8x8xf32>
    %26 = math.exp %25 : vector<8x8xf32>
    %cst_15 = arith.constant dense<0.000000e+00> : vector<8xf32>
    %27 = vector.multi_reduction <add>, %26, %cst_15 [1] : vector<8x8xf32> to vector<8xf32>
    %28 = vector.shape_cast %27 : vector<8xf32> to vector<8x1xf32>
    %29 = tpu.reciprocal %28 {approx = true} : vector<8x1xf32> -> vector<8x1xf32>
    %30 = vector.broadcast %29 : vector<8x1xf32> to vector<8x8xf32>
    %31 = arith.mulf %26, %30 : vector<8x8xf32>
    %c0_16 = arith.constant 0 : index
    %c0_17 = arith.constant 0 : index
    %c0_18 = arith.constant 0 : index
    %c0_19 = arith.constant 0 : index
    %32 = vector.load %arg11[%c0_16, %c0_17, %c0_18, %c0_19] : memref<1x1x8x8xf32, #tpu.memory_space<vmem>>, vector<1x1x8x8xf32>
    %33 = vector.shape_cast %32 : vector<1x1x8x8xf32> to vector<8x8xf32>
    %34 = vector.shape_cast %31 : vector<8x8xf32> to vector<1x1x8x8xf32>
    tpu.vector_store %arg11[%c0_16, %c0_17, %c0_18, %c0_19], %34 {strides = array<i32>} : memref<1x1x8x8xf32, #tpu.memory_space<vmem>>, vector<1x1x8x8xf32>,
    %cst_20 = arith.constant dense<0.000000e+00> : vector<8x8xf32>
    %35 = tpu.matmul %31, %16, %cst_20 {dimension_numbers = #tpu.dot_dimension_numbers<[1], [0], [0], [1], [0, 0, 1, 1], [], []>} : vector<8x8xf32>, vector<8x8xf32>, vector<8x8xf32> -> vector<8x8xf32>
    %c0_21 = arith.constant 0 : index
    %c0_22 = arith.constant 0 : index
    %36 = vector.load %arg12[%c0_21, %c0_22] : memref<8x32xf32, #tpu.memory_space<vmem>>, vector<8x32xf32>
    %c0_23 = arith.constant 0 : index
    %c0_24 = arith.constant 0 : index
    %c0_25 = arith.constant 0 : index
    %37 = vector.load %arg6[%c0_23, %c0_24, %c0_25] : memref<1x8x32xf32, #tpu.memory_space<vmem>>, vector<1x8x32xf32>
    %38 = vector.shape_cast %37 : vector<1x8x32xf32> to vector<8x32xf32>
    %cst_26 = arith.constant dense<0.000000e+00> : vector<8x32xf32>
    %39 = tpu.matmul %35, %38, %cst_26 {dimension_numbers = #tpu.dot_dimension_numbers<[1], [0], [0], [1], [0, 0, 1, 1], [], []>} : vector<8x8xf32>, vector<8x32xf32>, vector<8x32xf32> -> vector<8x32xf32>
    %40 = arith.addf %36, %39 : vector<8x32xf32>
    %c0_27 = arith.constant 0 : index
    %c0_28 = arith.constant 0 : index
    %41 = vector.load %arg12[%c0_27, %c0_28] : memref<8x32xf32, #tpu.memory_space<vmem>>, vector<8x32xf32>
    tpu.vector_store %arg12[%c0_27, %c0_28], %40 {strides = array<i32>} : memref<8x32xf32, #tpu.memory_space<vmem>>, vector<8x32xf32>,
    %c3_i32 = arith.constant 3 : i32
    %42 = arith.cmpi eq, %arg1, %c3_i32 : i32
    %43 = arith.extui %42 : i1 to i32
    %c0_i32_29 = arith.constant 0 : i32
    %44 = arith.cmpi ne, %43, %c0_i32_29 : i32
    scf.if %44 {
      %c0_30 = arith.constant 0 : index
      %c0_31 = arith.constant 0 : index
      %45 = vector.load %arg12[%c0_30, %c0_31] : memref<8x32xf32, #tpu.memory_space<vmem>>, vector<8x32xf32>
      %c0_32 = arith.constant 0 : index
      %c0_33 = arith.constant 0 : index
      %46 = vector.load %arg7[%c0_32, %c0_33] : memref<1x32xf32, #tpu.memory_space<vmem>>, vector<1x32xf32>
      %47 = vector.broadcast %46 : vector<1x32xf32> to vector<8x32xf32>
      %48 = arith.addf %45, %47 : vector<8x32xf32>
      %c0_34 = arith.constant 0 : index
      %c0_35 = arith.constant 0 : index
      %c0_36 = arith.constant 0 : index
      %49 = vector.load %arg2[%c0_34, %c0_35, %c0_36] : memref<1x8x32xf32, #tpu.memory_space<vmem>>, vector<1x8x32xf32>
      %50 = vector.shape_cast %49 : vector<1x8x32xf32> to vector<8x32xf32>
      %51 = arith.addf %48, %50 : vector<8x32xf32>
      %cst_37 = arith.constant dense<0.000000e+00> : vector<8xf32>
      %52 = vector.multi_reduction <add>, %51, %cst_37 [1] : vector<8x32xf32> to vector<8xf32>
      %53 = vector.shape_cast %52 : vector<8xf32> to vector<8x1xf32>
      %cst_38 = arith.constant 3.200000e+01 : f32
      %54 = vector.broadcast %cst_38 : f32 to vector<8x1xf32>
      %55 = arith.divf %53, %54 : vector<8x1xf32>
      %56 = arith.mulf %51, %51 : vector<8x32xf32>
      %cst_39 = arith.constant dense<0.000000e+00> : vector<8xf32>
      %57 = vector.multi_reduction <add>, %56, %cst_39 [1] : vector<8x32xf32> to vector<8xf32>
      %58 = vector.shape_cast %57 : vector<8xf32> to vector<8x1xf32>
      %cst_40 = arith.constant 3.200000e+01 : f32
      %59 = vector.broadcast %cst_40 : f32 to vector<8x1xf32>
      %60 = arith.divf %58, %59 : vector<8x1xf32>
      %61 = arith.mulf %55, %55 : vector<8x1xf32>
      %62 = arith.subf %60, %61 : vector<8x1xf32>
      %63 = vector.broadcast %55 : vector<8x1xf32> to vector<8x32xf32>
      %64 = arith.subf %51, %63 : vector<8x32xf32>
      %cst_41 = arith.constant 9.99999996E-13 : f32
      %65 = vector.broadcast %cst_41 : f32 to vector<8x1xf32>
      %66 = arith.addf %62, %65 : vector<8x1xf32>
      %67 = math.rsqrt %66 : vector<8x1xf32>
      %68 = vector.broadcast %67 : vector<8x1xf32> to vector<8x32xf32>
      %69 = arith.mulf %64, %68 : vector<8x32xf32>
      %c0_42 = arith.constant 0 : index
      %c0_43 = arith.constant 0 : index
      %70 = vector.load %arg8[%c0_42, %c0_43] : memref<1x32xf32, #tpu.memory_space<vmem>>, vector<1x32xf32>
      %71 = vector.broadcast %70 : vector<1x32xf32> to vector<8x32xf32>
      %72 = arith.mulf %69, %71 : vector<8x32xf32>
      %c0_44 = arith.constant 0 : index
      %c0_45 = arith.constant 0 : index
      %73 = vector.load %arg9[%c0_44, %c0_45] : memref<1x32xf32, #tpu.memory_space<vmem>>, vector<1x32xf32>
      %74 = vector.broadcast %73 : vector<1x32xf32> to vector<8x32xf32>
      %75 = arith.addf %72, %74 : vector<8x32xf32>
      %c0_46 = arith.constant 0 : index
      %c0_47 = arith.constant 0 : index
      %c0_48 = arith.constant 0 : index
      %76 = vector.load %arg10[%c0_46, %c0_47, %c0_48] : memref<1x8x32xf32, #tpu.memory_space<vmem>>, vector<1x8x32xf32>
      %77 = vector.shape_cast %76 : vector<1x8x32xf32> to vector<8x32xf32>
      %78 = vector.shape_cast %75 : vector<8x32xf32> to vector<1x8x32xf32>
      tpu.vector_store %arg10[%c0_46, %c0_47, %c0_48], %78 {strides = array<i32>} : memref<1x8x32xf32, #tpu.memory_space<vmem>>, vector<1x8x32xf32>,
    } else {
    }
    return
  }
  func.func @transform_0(%arg0: i32, %arg1: i32) -> (i32, i32, i32) {
    %c0_i32 = arith.constant 0 : i32
    %c0_i32_0 = arith.constant 0 : i32
    %c0_i32_1 = arith.constant 0 : i32
    return %arg0, %c0_i32, %c0_i32_0 : i32, i32, i32
  }
  func.func @transform_1(%arg0: i32, %arg1: i32) -> (i32, i32, i32) {
    %c0_i32 = arith.constant 0 : i32
    %c0_i32_0 = arith.constant 0 : i32
    %c0_i32_1 = arith.constant 0 : i32
    return %arg0, %c0_i32, %c0_i32_0 : i32, i32, i32
  }
  func.func @transform_2(%arg0: i32, %arg1: i32) -> (i32, i32, i32) {
    %c0_i32 = arith.constant 0 : i32
    %c0_i32_0 = arith.constant 0 : i32
    %c0_i32_1 = arith.constant 0 : i32
    return %arg1, %c0_i32, %c0_i32_0 : i32, i32, i32
  }
  func.func @transform_3(%arg0: i32, %arg1: i32) -> (i32, i32, i32) {
    %c0_i32 = arith.constant 0 : i32
    %c0_i32_0 = arith.constant 0 : i32
    %c0_i32_1 = arith.constant 0 : i32
    return %arg1, %c0_i32, %c0_i32_0 : i32, i32, i32
  }
  func.func @transform_4(%arg0: i32, %arg1: i32) -> (i32, i32, i32) {
    %c0_i32 = arith.constant 0 : i32
    %c0_i32_0 = arith.constant 0 : i32
    %c0_i32_1 = arith.constant 0 : i32
    return %arg1, %c0_i32, %c0_i32_0 : i32, i32, i32
  }
  func.func @transform_5(%arg0: i32, %arg1: i32) -> (i32, i32) {
    %c0_i32 = arith.constant 0 : i32
    %c0_i32_0 = arith.constant 0 : i32
    %c0_i32_1 = arith.constant 0 : i32
    return %c0_i32, %c0_i32_0 : i32, i32
  }
  func.func @transform_6(%arg0: i32, %arg1: i32) -> (i32, i32) {
    %c0_i32 = arith.constant 0 : i32
    %c0_i32_0 = arith.constant 0 : i32
    %c0_i32_1 = arith.constant 0 : i32
    return %c0_i32, %c0_i32_0 : i32, i32
  }
  func.func @transform_7(%arg0: i32, %arg1: i32) -> (i32, i32) {
    %c0_i32 = arith.constant 0 : i32
    %c0_i32_0 = arith.constant 0 : i32
    %c0_i32_1 = arith.constant 0 : i32
    return %c0_i32, %c0_i32_0 : i32, i32
  }
  func.func @transform_8(%arg0: i32, %arg1: i32) -> (i32, i32, i32) {
    %c0_i32 = arith.constant 0 : i32
    %c0_i32_0 = arith.constant 0 : i32
    %c0_i32_1 = arith.constant 0 : i32
    return %arg0, %c0_i32, %c0_i32_0 : i32, i32, i32
  }
  func.func @transform_9(%arg0: i32, %arg1: i32) -> (i32, i32, i32, i32) {
    %c0_i32 = arith.constant 0 : i32
    %c0_i32_0 = arith.constant 0 : i32
    %c0_i32_1 = arith.constant 0 : i32
    return %arg0, %arg1, %c0_i32, %c0_i32_0 : i32, i32, i32, i32
  }
}

</mosaic_0001>

<bundles_post_ra>
// kernel: tpu_custom_call.1
= control target key start
LH: loop header
LB: loop body
LE: loop exit
PB: predicated region body
PF: predicated region fallthrough
CT: control target
= control target key end

     0   :  { %s1686_s0 = inlined_call_operand.vmem [shape: f32[2,8,32], index: 0, kind: input, shape index: {}]   ;;  %s1687_s1 = inlined_call_operand.vmem [shape: f32[2,1,8], index: 1, kind: input, shape index: {}]   ;;  %s1688_s2 = inlined_call_operand.vmem [shape: f32[4,32,24], index: 2, kind: input, shape index: {}]   ;;  %s1689_s3 = inlined_call_operand.vmem [shape: f32[4,1,24], index: 3, kind: input, shape index: {}]   ;;  %s1690_s4 = inlined_call_operand.vmem [shape: f32[4,8,32], index: 4, kind: input, shape index: {}]   ;;  %s1691_s5 = inlined_call_operand.vmem [shape: f32[1,32], index: 5, kind: input, shape index: {}]   ;;  %s1692_s6 = inlined_call_operand.vmem [shape: f32[1,32], index: 6, kind: input, shape index: {}]   ;;  %s1693_s7 = inlined_call_operand.vmem [shape: f32[1,32], index: 7, kind: input, shape index: {}]   ;;  %s1694_s8 = inlined_call_operand.hbm [shape: f32[2,8,32], index: 8, kind: output, shape index: {0}]   ;;  %s1695_s9 = inlined_call_operand.hbm [shape: f32[2,4,8,8], index: 9, kind: output, shape index: {1}]  }
   0x1   :  { %1718 = sst [smem:[#allocation26_spill]] %s1694_s8 }
   0x2   :  { %1719 = sst [smem:[#allocation27_spill]] %s1695_s9 }
   0x3   :  { %15 = vsyncpa [#allocation4], 0 }
   0x4   :  { %17 = vsyncpa [#allocation4 + $0x1], 0 }
   0x5   :  { %18 = vsyncpa [#allocation6], 0 }
   0x6   :  { %20 = vsyncpa [#allocation6 + $0x1], 0  ;;  %s1386_s30 = smov 0   ;;  %s1388_s10 = smov 0  }
   0x7   :  { %s1390_s11 = smov 0   ;;  %s1392_s12 = smov 0  }
   0x8   :  { %s1394_s13 = smov 0   ;;  %s1396_s14 = smov 0  }
   0x9   :  { %s1398_s15 = smov 0   ;;  %s1400_s16 = smov 0  }
   0xa   :  { %s1402_s17 = smov 0   ;;  %s1404_s18 = smov 0  }
   0xb   :  { %s1406_s19 = smov 0  }
   0xc LB: > { %1720 = sst [smem:[#allocation9_spill]] %s1286_s30  ;;  %s990_s20 = sadd.s32 4294967295, %s1326_s19   ;;  %s1326_s19 = sphi %s1406_s19, %s26_s19   ;;  %s1322_s18 = sphi %s1404_s18, %s1768_s18   ;;  %s1318_s17 = sphi %s1402_s17, %s1767_s17   ;;  %s1314_s16 = sphi %s1400_s16, %s1766_s16   ;;  %s1310_s15 = sphi %s1398_s15, %s1765_s15   ;;  %s1306_s14 = sphi %s1396_s14, %s1764_s14   ;;  %s1302_s13 = sphi %s1394_s13, %s1763_s13   ;;  %s1298_s12 = sphi %s1392_s12, %s1762_s12   ;;  %s1294_s11 = sphi %s1390_s11, %s1761_s11   ;;  %s1290_s10 = sphi %s1388_s10, %s1760_s10   ;;  %s1286_s30 = sphi %s1386_s30, %s1759_s30  }
   0xd   : > { %1721 = sst [smem:[#allocation10_spill]] %s1290_s10  ;;  %s991_s21 = sadd.s32 4294967294, %s1326_s19  }
   0xe   : > { %1722 = sst [smem:[#allocation11_spill]] %s1294_s11  ;;  %s35_s22 = sadd.s32 1, %s1318_s17 }
   0xf   : > { %1723 = sst [smem:[#allocation12_spill]] %s1298_s12  ;;  %s38_s23 = sadd.s32 1, %s1322_s18 }
  0x10   : > { %1724 = sst [smem:[#allocation13_spill]] %s1302_s13  ;;  %p36_p0 = scmp.ge.s32.totalorder %s35_s22, 4 }
  0x11   : > { %1725 = sst [smem:[#allocation14_spill]] %s1306_s14  ;;  %s238_s24 = sadd.s32 1, %s1306_s14 }
  0x12   : > { %1726 = sst [smem:[#allocation15_spill]] %s1318_s17  ;;  %p248_p1 = scmp.ne.s32.totalorder %s1306_s14, %s1302_s13 }
  0x13   : > { %1727 = sst [smem:[#allocation16_spill]] %s1322_s18  ;;  %p1448_p2 = scmp.eq.s32.totalorder %s990_s20, 7 }
  0x14   : > { %1728 = sst [smem:[#allocation17_spill]] %s1326_s19  ;;  %s1770_s22 = smov (%p36_p0, %s35_s22), 0 }
  0x15   : > { %1730 = sst [smem:[#allocation18_spill]] %s1770_s22  ;;  %s1772_s23 = smov (!%p36_p0, %s38_s23), %s1322_s18 }
  0x16   : > { %p1457_p3 = por %p1448_p2, %p248_p1  ;;  %p254_p4 = scmp.ne.s32.totalorder %s1302_s13, %s1298_s12 }
  0x17   : > { %p40_p5 = scmp.ge.s32.totalorder %s1772_s23, 2  ;;  %p1463_p6 = scmp.eq.s32.totalorder %s991_s21, 7 }
  0x18   : > { %s1731_s26 = scalar_select %p1457_p3, 1, 0 }
  0x19   : > { %s262_s28 = ssub.s32 %s1318_s17, %s1770_s22  ;;  %s266_s29 = sadd.s32 1, %s1294_s11 }
  0x1a   : > { %1732 = sst [smem:[#allocation19_spill]] %s1731_s26  ;;  %s1774_s23 = smov (%p40_p5, %s1772_s23), 0 }
  0x1b   : > { %1734 = sst [smem:[#allocation20_spill]] %s1774_s23  ;;  %p1474_p7 = por %p1463_p6, %p254_p4 }
  0x1c   : > { %p276_p8 = scmp.ne.s32.totalorder %s1294_s11, %s1290_s10  ;;  %s235_s12 = ssub.s32 %s1322_s18, %s1774_s23 }
  0x1d   : > { %s1735_s20 = scalar_select %p1474_p7, 1, 0 }
  0x1e   : > { %p282_p9 = scmp.ne.s32.totalorder %s1290_s10, %s1286_s30  ;;  %p236_p10 = scmp.eq.s32.totalorder %s235_s12, 0 }
  0x1f   : > { %1736 = sst [smem:[#allocation21_spill]] %s1735_s20  ;;  %s263_s21 = sor.u32 %s262_s28, %s235_s12 }
  0x20   : > { %p264_p11 = scmp.eq.s32.totalorder %s263_s21, 0  ;;  %p1486_p12 = por %p276_p8, %p1448_p2 }
  0x21   : > { %s1491_s22 = scalar_select %p236_p10, %s1306_s14, %s238_s24  }
  0x22   : > { %s1737_s9 = scalar_select %p1486_p12, 1, 0 }
  0x23   : > { %1739 = sst [smem:[#allocation23_spill]] %s1491_s22  ;;  %p1498_p13 = por %p282_p9, %p1463_p6 }
  0x24   : > { %1738 = sst [smem:[#allocation22_spill]] %s1737_s9  ;;  %p994_p0 = scmp.ge.s32.totalorder %s1326_s19, 1 }
  0x25   : > { %s1494_s17 = scalar_select %p264_p11, %s1294_s11, %s266_s29  }
  0x26   : > { %s1741_s8 = scalar_select %p1498_p13, 1, 0 }
  0x27   : > { %1740 = sst [smem:[#allocation24_spill]] %s1494_s17  ;;  %p344_p1 = scmp.lt.s32.totalorder %s1326_s19, 9 }
  0x28   : > { %1742 = sst [smem:[#allocation25_spill]] %s1741_s8 }
  0x29   : > { %p345_p4 = pnand %p994_p0, %p344_p1 }
  0x2a   : > { %s1702_s12 = sand.u32 (!%p345_p4), 1, %s1302_s13   ;;  %s1704_s24 = sand.u32 (!%p345_p4), 1, %s1290_s10  }
  0x2b   : > { %348 = sbr.rel (%p345_p4) target bundleno = 1592 (0x638), region = 52  ;;  %s1508_s25 = sshll.u32 (!%p345_p4), %s1702_s12, 3 }
  0x2c   : > { %s1512_s27 = sshll.u32 (!%p345_p4), %s1704_s24, 3  ;;  %p399_p2 = scmp.lt.s32.totalorder (!%p345_p4), %s1314_s16, 1 }
  0x2d   : > { %p406_p5 = scmp.lt.s32.totalorder (!%p345_p4), %s1310_s15, 3  ;;  %s391_s12 = scalar_lea.vmem (!%p345_p4), [#allocation3], %s1508_s25 }
  0x2e   : > { %s398_s18 = scalar_lea.vmem (!%p345_p4), [#allocation5], %s1512_s27  ;;  %p1001_p6 = scmp.ne.s32.totalorder (!%p345_p4), %s1310_s15, 0 }
  0x32   : > { %s1517_s28 = scalar_select %p399_p2, %s1314_s16, 1 }
  0x33   : > { %s1520_s29 = scalar_select %p406_p5, %s1310_s15, 3 }
  0x34   : > { %s997_s21 = sshll.u32 %s1517_s28, 3  ;;  %421 = sbr.rel (%p1001_p6) target bundleno = 59 (0x3b), region = 56  ;;  %vm422_vm0 = vcmask (!%p1001_p6), 261120   ;;  %v1328_v0 = vmov (!%p1001_p6), 0.0  }
  0x35   : > { %s1530_s14 = scalar_lea.vmem %s1686_s0, %s997_s21  ;;  %s1020_s17 = sshll.u32 %s1520_s29, 5  ;;  %423 = vst.msk [vmem:[#allocation2] sm:$0xff] (!%p1001_p6), %vm422_vm0, %v1328_v0 }
  0x36   : > { %s410_s30 = scalar_lea.vmem %s1688_s2, %s1020_s17  ;;  %s413_s9 = scalar_lea.vmem %s1689_s3, %s1520_s29 }
  0x37   : > { %s1000_s10 = sshll.u32 %s1520_s29, 3 }
  0x38   : > { %s1544_s23 = scalar_lea.vmem %s1690_s4, %s1000_s10 }
  0x3b PF: > { %v426_v1 = vld [vmem:[%s410_s30] sm:$0xff]  ;;  %v427_v2 = vld [vmem:[%s410_s30 + $0x8] sm:$0xff]  ;;  %v428_v3 = vld [vmem:[%s410_s30 + $0x10] sm:$0xff]  ;;  %v1329_v4 = vmov 0.0|0.0   ;;  %vm1330_vm1 = vmmov 0   ;;  %v1331_v7 = vmov 0.0   ;;  %s1743_s17 = scalar_lea.vmem %s1687_s1, %s1517_s28 }
  0x3c   : > { %1058 = vmatprep.subr.bf16.mxu0 %v1329_v4  ;;  %v1059_v5 = vpack.c.bf16 %v427_v2, %v426_v1  ;;  %v429_v6 = vld [vmem:[%s410_s30 + $0x18] sm:$0xff]  ;;  %1040 = vmatprep.mubr.msk.f32.mxu0 %vm1330_vm1, %v1331_v7  ;;  %v424_v9 = vld [vmem:[%s1530_s14] sm:$0xff]  ;;  %vm437_vm2 = vcmask 261120   ;;  %s1332_s10 = smov 120   ;;  %vm514_vm3 = vcmask 64512   ;;  %p1009_p8 = scmp.ne.s32.totalorder %s1310_s15, 3 }
  0x3d   : > { %1043 = vmatprep.subr.mxu1 %v1331_v7  ;;  %1045 = vmatprep.mubr.msk.f32.mxu1 %vm1330_vm1, %v1331_v7  ;;  %v1062_v8 = vpack.c.bf16 %v429_v6, %v428_v3  ;;  %v1002_v10 = vld [vmem:[%s413_s9] ss:$0 sm:$0xff]  ;;  %s1333_s9 = smov 112  }
  0x3e   : > { %1060 = vmatpush3.bf16.msra.mxu0 %v1059_v5  ;;  %v1006_v16 = vld [vmem:[%s1743_s17] ss:$0 sm:$0xff] }
  0x3f   : > { %1061 = vmatprep.subr.bf16.mxu0 %v1329_v4  ;;  %v686_v26 = vld [vmem:[%s1544_s23] sm:$0xff] }
  0x40   : > { %v685_v33 = vld [vmem:[#allocation2] sm:$0xff] }
  0x41   : > { %v1010_v38 = vld [vmem:[%s1691_s5] ss:$0 sm:$0xff] (!%p1009_p8) }
  0x42   : > { %1063 = vmatpush3.bf16.msra.mxu0 %v1062_v8  ;;  %v775_v39 = vld [vmem:[%s1530_s14] sm:$0xff] (!%p1009_p8) }
  0x43   : > { %1053 = vmatprep.subr.mxu0 %v1331_v7  ;;  %v1011_v54 = vld [vmem:[%s1692_s6] ss:$0 sm:$0xff] (!%p1009_p8) }
  0x44   : > { %v1012_v56 = vld [vmem:[%s1693_s7] ss:$0 sm:$0xff] (!%p1009_p8) }
  0x45   : > { %1041 = vmatmul.mubr.msk.f32.vlgmr.msra.gmra.mrb[0].mxu0 %vm437_vm2, %v424_v9 }
  0x46   : > { %1055 = vmatprep.mubr.msk.f32.mxu0 %vm1330_vm1, %v1331_v7  ;;  %1054 = vmatpush3.msra.mxu0 %v686_v26 }
 0x118   : > { %v507_v11 = vpop.f32.mrb[0].mxu0 }
 0x119   : > { %v508_v12 = vadd.f32 %v1002_v10, %v507_v11  ;;  %v1042_v13 = vpop.f32.mrb[1].mxu0 }
 0x11b   : > { %512 = vrot.lane.b32.xlu0 %v508_v12, %s1332_s10 }
 0x18d   : > { %v513_v14 = vpop.permute.xlu0 %512 }
 0x18e   : > { %1044 = vmatpush3.xpose.msk.msra.mxu1 %vm514_vm3, %v513_v14 }
 0x18f   : > { %1048 = vmatprep.subr.mxu1 %v1331_v7 }
 0x191   : > { %1046 = vmatmul.mubr.msk.f32.vlgmr.msra.gmra.mrb[0].mxu1 %vm514_vm3, %v508_v12 }
 0x192   : > { %1050 = vmatprep.mubr.msk.f32.mxu1 %vm1330_vm1, %v1331_v7 }
 0x264   : > { %v585_v15 = vpop.f32.mrb[0].mxu1 }
 0x265   : > { %v589_v17 = vmul.f32 0.35355338, %v585_v15  ;;  %v1047_v18 = vpop.f32.mrb[1].mxu1 }
 0x267   : > { %v596_v19 = vadd.f32 %v1006_v16, %v589_v17 }
 0x269   : > { %v597_v20 = vsel %vm514_vm3, %v596_v19, -inf }
 0x26a   : > { %598 = vmax.xlane.f32.xlu0 %v597_v20 }
 0x2f7   : > { %v599_v21 = vpop.xlane.xlu0 %598 }
 0x2f8   : > { %v600_v22 = vsub.f32 %v596_v19, %v599_v21 }
 0x2fa   : > { %v601_v23 = vmul.f32 1.442695, %v600_v22 }
 0x2fc   : > { %1170 = vpow2.f32 %v601_v23 }
 0x306   : > { %v1171_v24 = vpop.eup %1170 }
 0x307   : > { %v603_v25 = vsel %vm514_vm3, %v1171_v24, 0.0 }
 0x308   : > { %604 = vadd.xlane.f32.xlu1 %v603_v25 }
 0x319   : > { %609 = vrot.lane.b32.xlu1 %v508_v12, %s1333_s9 }
 0x395   : > { %v605_v27 = vpop.xlane.xlu1 %604 }
 0x396   : > { %1172 = vrcp.f32 %v605_v27 }
 0x399   : > { %v610_v28 = vpop.permute.xlu1 %609 }
 0x39a   : > { %1049 = vmatpush3.msra.mxu1 %v610_v28 }
 0x3a0   : > { %v1173_v29 = vpop.eup %1172 }
 0x3a1   : > { %v607_v30 = vmul.f32 %v1173_v29, %v1171_v24 }
 0x3a3   : > { %608 = vst.msk [vmem:[%s398_s18] sm:$0xff] %vm514_vm3, %v607_v30  ;;  %1051 = vmatmul.mubr.msk.f32.vlgmr.msra.gmra.mrb[2].mxu1 %vm514_vm3, %v607_v30 }
 0x476   : > { %v681_v31 = vpop.f32.mrb[2].mxu1 }
 0x477   : > { %v1052_v32 = vpop.f32.mrb[3].mxu1  ;;  %1056 = vmatmul.mubr.msk.f32.vlgmr.msra.gmra.mrb[2].mxu0 %vm514_vm3, %v681_v31 }
 0x547   : > { %765 = sbr.rel (%p1009_p8) target bundleno = 1540 (0x604), region = 60 }
 0x54a   : > { %v756_v34 = vpop.f32.mrb[2].mxu0 }
 0x54b   : > { %v760_v35 = vadd.f32 %v756_v34, %v685_v33  ;;  %v1057_v36 = vpop.f32.mrb[3].mxu0 }
 0x54d   : > { %761 = vst.msk [vmem:[#allocation2] sm:$0xff] %vm437_vm2, %v760_v35 }
 0x554   : > { %v766_v37 = vld [vmem:[#allocation2] sm:$0xff] }
 0x555   : > { %v774_v40 = vadd.f32 %v1010_v38, %v766_v37 }
 0x557   : > { %v776_v41 = vadd.f32 %v775_v39, %v774_v40 }
 0x559   : > { %v777_v42 = vsel %vm437_vm2, %v776_v41, 0.0  ;;  %v782_v43 = vmul.f32 %v776_v41, %v776_v41 }
 0x55a   : > { %778 = vadd.xlane.f32.xlu0 %v777_v42 }
 0x55b   : > { %v783_v44 = vsel %vm437_vm2, %v782_v43, 0.0 }
 0x55e   : > { %784 = vadd.xlane.f32.xlu0 %v783_v44 }
 0x5e7   : > { %v779_v45 = vpop.xlane.xlu0 %778 }
 0x5e8   : > { %v781_v46 = vmul.f32 0.03125, %v779_v45 }
 0x5ea   : > { %v787_v48 = vmul.f32 %v781_v46, %v781_v46  ;;  %v789_v52 = vsub.f32 %v776_v41, %v781_v46 }
 0x5eb   : > { %v785_v47 = vpop.xlane.xlu0 %784 }
 0x5ec   : > { %v786_v49 = vmul.f32 0.03125, %v785_v47 }
 0x5ee   : > { %v788_v50 = vsub.f32 %v786_v49, %v787_v48 }
 0x5f0   : > { %v790_v51 = vadd.f32 1e-12, %v788_v50 }
 0x5f2   : > { %1174 = vrsqrt.f32 %v790_v51 }
 0x5fc   : > { %v1175_v53 = vpop.eup %1174 }
 0x5fd   : > { %v792_v55 = vmul.f32 %v1175_v53, %v789_v52 }
 0x5ff   : > { %v800_v57 = vmul.f32 %v1011_v54, %v792_v55 }
 0x601   : > { %v808_v58 = vadd.f32 %v1012_v56, %v800_v57 }
 0x603   : > { %809 = vst.msk [vmem:[%s391_s12] sm:$0xff] %vm437_vm2, %v808_v58 }
 0x604 PF: > { %s1744_s28 = sld [smem:[#allocation13_spill]]  ;;  %s1015_s21 = sshll.u32 %s1314_s16, 7 }
 0x605   : > { %s1746_s30 = sld [smem:[#allocation26_spill]]  ;;  %s829_s11 = sshll.u32 %s391_s12, 4  ;;  %s830_s11 = int_to_ptr.vmem [resolvable:$true] %s829_s11 }
 0x606   : > { %s1176_s19 = scalar_lea.vmem %s830_s11, 128  ;;  %s1334_s22 = smov [#allocation3]  }
 0x607   : > { %p1177_p9 = scmp.ne.s32.totalorder %s830_s11, %s1176_s19  ;;  %s1180_s14 = sshll.u32 %s1334_s22, 4  ;;  %s1181_s14 = int_to_ptr.vmem [resolvable:$false] %s1180_s14 }
 0x608   : > { %s1182_s26 = scalar_lea.vmem %s1181_s14, 256  ;;  %p1183_p0 = scmp.lt.s32.totalorder %s830_s11, %s1181_s14 }
 0x609   : > { %p1178_p10 = pnand %p1177_p9, %p1457_p3  ;;  %p1184_p1 = scmp.lt.s32.totalorder %s1182_s26, %s1176_s19 }
 0x60a   : > { %s1748_s13 = sand.u32 1, %s1744_s28  }
 0x60b   : > { %s1747_s9 = smov %s1746_s30  ;;  %s1596_s10 = scalar_lea.hbm %s1746_s30, %s1015_s21 }
 0x60c   : > { %s811_s17 = scalar_lea.sflag [#allocation4], %s1748_s13  ;;  %p1179_p11 = pneg %p1178_p10 }
 0x60d   : > { %p1185_p4 = por %p1184_p1, %p1183_p0 }
 0x60f   : > { %p1186_p2 = pnand %p1185_p4, %p1179_p11 }
 0x611   : > { %1189 = shalt.err (!%p1186_p2)
}
 0x612   : > { %s1190_s25 = scalar_lea.hbm %s1596_s10, 128  ;;  %s1194_s24 = scalar_lea.hbm %s1747_s9, 256 }
 0x613   : > { %p1191_p5 = scmp.ne.s32.totalorder %s1596_s10, %s1190_s25  ;;  %p1195_p9 = scmp.lt.u32.totalorder %s1596_s10, %s1747_s9 }
 0x614   : > { %p1196_p10 = scmp.lt.u32.totalorder %s1194_s24, %s1190_s25  ;;  %p1198_p0 = scmp.lt.u32.totalorder %s1190_s25, %s1596_s10 }
 0x615   : > { %p1192_p6 = pnand %p1191_p5, %p1457_p3 }
 0x616   : > { %p1197_p11 = por %p1196_p10, %p1195_p9 }
 0x617   : > { %p1193_p8 = pneg %p1192_p6 }
 0x618   : > { %p1199_p1 = por %p1198_p0, %p1197_p11 }
 0x61a   : > { %p1200_p4 = pnand %p1199_p1, %p1193_p8 }
 0x61c   : > { %1203 = shalt.err (!%p1200_p4)
}
 0x61d   : > { %s1749_s23 = sld [smem:[#allocation10_spill]]  ;;  %s1016_s30 = sshll.u32 %s1314_s16, 2 }
 0x61e   : > { %1064 = dma.vmem_to_hbm [thread:$0]  (%p1457_p3), %s830_s11, 128, %s1596_s10, %s811_s17  }
 0x61f   : > { %s844_s13 = sshll.u32 %s398_s18, 4  ;;  %s840_s19 = sadd.s32 %s1310_s15, %s1016_s30  ;;  %s1623_s13 = int_to_ptr.vmem [resolvable:$true] %s844_s13 }
 0x620   : > { %s1017_s22 = sshll.u32 %s840_s19, 7  ;;  %s1751_s29 = sld [smem:[#allocation27_spill]] }
 0x621   : > { %s1204_s24 = scalar_lea.vmem %s1623_s13, 128  ;;  %s1335_s16 = smov [#allocation5]  }
 0x622   : > { %p1205_p2 = scmp.ne.s32.totalorder %s1623_s13, %s1204_s24  ;;  %s1208_s18 = sshll.u32 %s1335_s16, 4  ;;  %s1209_s18 = int_to_ptr.vmem [resolvable:$false] %s1208_s18 }
 0x623   : > { %s1752_s12 = sand.u32 1, %s1749_s23   ;;  %s1210_s15 = scalar_lea.vmem %s1209_s18, 256 }
 0x624   : > { %s816_s20 = scalar_lea.sflag [#allocation6], %s1752_s12  ;;  %p1206_p3 = pnand %p1205_p2, %p1486_p12 }
 0x625   : > { %p1211_p6 = scmp.lt.s32.totalorder %s1623_s13, %s1209_s18  ;;  %p1212_p8 = scmp.lt.s32.totalorder %s1210_s15, %s1204_s24 }
 0x626   : > { %s842_s25 = scalar_lea.hbm %s1751_s29, %s1017_s22  ;;  %p1207_p5 = pneg %p1206_p3 }
 0x627   : > { %p1213_p9 = por %p1212_p8, %p1211_p6 }
 0x629   : > { %p1214_p10 = pnand %p1213_p9, %p1207_p5 }
 0x62b   : > { %1217 = shalt.err (!%p1214_p10)
}
 0x62c   : > { %s1218_s27 = scalar_lea.hbm %s842_s25, 128  ;;  %s1222_s17 = scalar_lea.hbm %s1751_s29, 1024 }
 0x62d   : > { %p1219_p11 = scmp.ne.s32.totalorder %s842_s25, %s1218_s27  ;;  %p1223_p4 = scmp.lt.u32.totalorder %s842_s25, %s1751_s29 }
 0x62e   : > { %p1224_p2 = scmp.lt.u32.totalorder %s1222_s17, %s1218_s27  ;;  %p1226_p13 = scmp.lt.u32.totalorder %s1218_s27, %s842_s25 }
 0x62f   : > { %p1220_p0 = pnand %p1219_p11, %p1486_p12 }
 0x630   : > { %p1225_p3 = por %p1224_p2, %p1223_p4 }
 0x631   : > { %p1221_p1 = pneg %p1220_p0 }
 0x632   : > { %p1227_p6 = por %p1226_p13, %p1225_p3 }
 0x634   : > { %p1228_p5 = pnand %p1227_p6, %p1221_p1 }
 0x636   : > { %1231 = shalt.err (!%p1228_p5)
}
 0x637   : > { %1065 = dma.vmem_to_hbm [thread:$0]  (%p1486_p12), %s1623_s13, 128, %s842_s25, %s816_s20  }
 0x638 PF: > { %s1753_s23 = sld [smem:[#allocation17_spill]]  ;;  %s1754_s30 = sld [smem:[#allocation12_spill]] }
 0x63e   : > { %p1075_p8 = scmp.ge.s32.totalorder %s1753_s23, 2  ;;  %s856_s22 = sand.u32 1, %s1754_s30  }
 0x63f   : > { %s857_s14 = scalar_lea.sflag [#allocation4], %s856_s22 }
 0x640   : > { %p1069_p9 = pnand %p1075_p8, %p1474_p7 }
 0x642   : > { %1277 = dma.done.wait (!%p1069_p9), %s857_s14, 128  }
 0x643   : > { %1279 = vsyncadd (!%p1069_p9), %s857_s14, 4294967168  ;;  %s1756_s26 = sld [smem:[#allocation9_spill]]  ;;  %s1757_s12 = sld [smem:[#allocation25_spill]] }
 0x649   : > { %s865_s24 = sand.u32 1, %s1756_s26   ;;  %p1758_p13 = scmp.ne.s32.totalorder %s1757_s12, 0 }
 0x64a   : > { %s866_s16 = scalar_lea.sflag [#allocation6], %s865_s24 }
 0x64b   : > { %p1072_p10 = pnand %p1075_p8, %p1758_p13 }
 0x64d   : > { %1281 = dma.done.wait (!%p1072_p10), %s866_s16, 128  }
 0x64e   : > { %1283 = vsyncadd (!%p1072_p10), %s866_s16, 4294967168  ;;  %s26_s19 = sadd.s32 1, %s1753_s23   ;;  %s1759_s30 = sld [smem:[#allocation10_spill]] }
 0x64f   : > { %p23_p12 = scmp.ge.s32.totalorder %s26_s19, 10   ;;  %s1760_s10 = sld [smem:[#allocation11_spill]] }
 0x650   : > { %s1761_s11 = sld [smem:[#allocation24_spill]]  ;;  %s1762_s12 = sld [smem:[#allocation13_spill]] }
 0x651   : > { %s1763_s13 = sld [smem:[#allocation14_spill]]  ;;  %s1764_s14 = sld [smem:[#allocation23_spill]] }
 0x652   : > { %s1765_s15 = sld [smem:[#allocation15_spill]]  ;;  %s1766_s16 = sld [smem:[#allocation16_spill]] }
 0x653   : > { %s1767_s17 = sld [smem:[#allocation18_spill]]  ;;  %s1768_s18 = sld [smem:[#allocation20_spill]] }
 0x654   :  { %25 = sbr.rel (!%p23_p12) target bundleno = 12 (0xc), region = 124 }
 0x65b   :  { %871 = vsyncpa [#allocation4], 1 }
 0x65c   :  { %873 = vsyncpa [#allocation4 + $0x1], 1 }
 0x65d   :  { %874 = vsyncpa [#allocation6], 1 }
 0x65e   :  { %876 = vsyncpa [#allocation6 + $0x1], 1 }

</bundles_post_ra>
